<compile_context>
chip_gen: v7x
topology: tpu7x:2x2x1
jax: 0.10.0
libtpu: 0.0.40
codegen_flags: <defaults>
</compile_context>

<pallas_src>
import functools

import jax
import jax.numpy as jnp
from jax.experimental import pallas as pl
from jax.experimental.pallas import tpu as pltpu


def _round_up(x, m):
    return (x + m - 1) // m * m


def _fused_mlp_kernel(x_ref, w_ref, b_ref, g_ref, beta_ref, o_ref, acc_ref,
                      *, m_valid, eps):
    k = pl.program_id(0)

    @pl.when(k == 0)
    def _():
        acc_ref[...] = jnp.zeros_like(acc_ref)

    # Pure MXU accumulate over the K tiles (bf16 operands, f32 accumulator).
    acc_ref[...] += jnp.dot(x_ref[...], w_ref[...],
                            preferred_element_type=jnp.float32)

    @pl.when(k == pl.num_programs(0) - 1)
    def _():
        y = acc_ref[...] + b_ref[...]                    # bias added once
        # Mask padded batch rows out of the BN statistics.
        rows = jax.lax.broadcasted_iota(jnp.int32, y.shape, 0)
        valid = rows < m_valid
        inv_m = 1.0 / m_valid
        mean = jnp.sum(jnp.where(valid, y, 0.0), axis=0, keepdims=True) * inv_m
        diff = jnp.where(valid, y - mean, 0.0)
        var = jnp.sum(diff * diff, axis=0, keepdims=True) * inv_m  # biased (train)
        xhat = (y - mean) * jax.lax.rsqrt(var + eps)
        o_ref[...] = jnp.maximum(xhat * g_ref[...] + beta_ref[...],
                                 0.0).astype(o_ref.dtype)


def mlp_module_forward(x, w, b, gamma, beta, *, eps=1e-5, block_k=512):
    """ReLU(BatchNorm1d(x @ w + b)) with BN in training mode.

    x: [M, K] f32, w: [K, N] f32, b/gamma/beta: [N] f32.  Returns [M, N] f32.
    """
    M, K = x.shape
    N = w.shape[1]

    Mp = _round_up(max(M, 8), 8)                 # sublane-aligned batch block
    Np = _round_up(max(N, 128), 128)             # lane-dense output stores
    TK = min(block_k, _round_up(max(K, 128), 128))
    Kp = _round_up(max(K, TK), TK)

    # Pad and cast matmul operands to bf16; keep bias/BN params in f32.
    xp = jnp.pad(x, ((0, Mp - M), (0, Kp - K))).astype(jnp.bfloat16)
    wp = jnp.pad(w, ((0, Kp - K), (0, Np - N))).astype(jnp.bfloat16)
    bp = jnp.pad(b, (0, Np - N)).reshape(1, Np).astype(jnp.float32)
    gp = jnp.pad(gamma, (0, Np - N), constant_values=1.0).reshape(1, Np).astype(jnp.float32)
    btp = jnp.pad(beta, (0, Np - N)).reshape(1, Np).astype(jnp.float32)

    kernel = functools.partial(_fused_mlp_kernel, m_valid=M, eps=eps)

    out = pl.pallas_call(
        kernel,
        out_shape=jax.ShapeDtypeStruct((Mp, Np), jnp.float32),
        grid=(Kp // TK,),
        in_specs=[
            pl.BlockSpec((Mp, TK), lambda k: (0, k)),    # activations: stream K
            pl.BlockSpec((TK, Np), lambda k: (k, 0)),    # weights: stream K
            pl.BlockSpec((1, Np), lambda k: (0, 0)),     # bias
            pl.BlockSpec((1, Np), lambda k: (0, 0)),     # gamma
            pl.BlockSpec((1, Np), lambda k: (0, 0)),     # beta
        ],
        out_specs=pl.BlockSpec((Mp, Np), lambda k: (0, 0)),
        scratch_shapes=[pltpu.VMEM((Mp, Np), jnp.float32)],   # f32 accumulator
        compiler_params=pltpu.CompilerParams(
            dimension_semantics=("arbitrary",),          # K is a reduction axis
            vmem_limit_bytes=32 * 1024 * 1024,
        ),
    )(xp, wp, bp, gp, btp)
    return out[:M, :N]


if __name__ == "__main__":
    key = jax.random.PRNGKey(0)
    kx, kw, kb, kg, kbt = jax.random.split(key, 5)

    batch, input_dim, output_dim = 4, 256, 96
    x = jax.random.normal(kx, (batch, input_dim), jnp.float32)
    w = jax.random.normal(kw, (input_dim, output_dim), jnp.float32) * 0.02
    b = jax.random.normal(kb, (output_dim,), jnp.float32) * 0.02
    gamma = 1.0 + 0.1 * jax.random.normal(kg, (output_dim,), jnp.float32)
    beta = 0.1 * jax.random.normal(kbt, (output_dim,), jnp.float32)

    # block_k=128 -> two K tiles, exercising the accumulating reduction loop.
    out = jax.block_until_ready(mlp_module_forward(x, w, b, gamma, beta, block_k=128))

    # Pure-JAX reference (same bf16 matmul precision, f32 accumulate).
    y = jnp.dot(x.astype(jnp.bfloat16), w.astype(jnp.bfloat16),
                preferred_element_type=jnp.float32) + b
    mean = jnp.mean(y, axis=0, keepdims=True)
    var = jnp.mean((y - mean) ** 2, axis=0, keepdims=True)        # biased, train mode
    ref = jnp.maximum((y - mean) * jax.lax.rsqrt(var + 1e-5) * gamma + beta, 0.0)

    assert out.shape == (batch, output_dim)
    assert bool(jnp.all(jnp.isfinite(out)))
    assert bool(jnp.allclose(out, ref, rtol=1e-2, atol=1e-2)), \
        float(jnp.max(jnp.abs(out - ref)))
    print("KERNEL_OK")
</pallas_src>

<mosaic_0001>
module attributes {stable_mosaic.version = 11 : i64} {
  func.func @_fused_mlp_kernel(%arg0: i32, %arg1: memref<8x128xbf16, #tpu.memory_space<vmem>>, %arg2: memref<128x128xbf16, #tpu.memory_space<vmem>>, %arg3: memref<1x128xf32, #tpu.memory_space<vmem>>, %arg4: memref<1x128xf32, #tpu.memory_space<vmem>>, %arg5: memref<1x128xf32, #tpu.memory_space<vmem>>, %arg6: memref<8x128xf32, #tpu.memory_space<vmem>>, %arg7: memref<8x128xf32, #tpu.memory_space<vmem>>) attributes {dimension_semantics = [#tpu.dimension_semantics<arbitrary>], iteration_bounds = array<i64: 2>, scalar_prefetch = 0 : i64, scratch_operands = 1 : i64, tpu.core_type = #tpu.core_type<tc>, window_params = [{transform_indices = @transform_0, window_bounds = array<i64: 8, 128>}, {transform_indices = @transform_1, window_bounds = array<i64: 128, 128>}, {pipeline_mode = #tpu.pipeline_mode<synchronous>, transform_indices = @transform_2, window_bounds = array<i64: 1, 128>}, {pipeline_mode = #tpu.pipeline_mode<synchronous>, transform_indices = @transform_3, window_bounds = array<i64: 1, 128>}, {pipeline_mode = #tpu.pipeline_mode<synchronous>, transform_indices = @transform_4, window_bounds = array<i64: 1, 128>}, {pipeline_mode = #tpu.pipeline_mode<synchronous>, transform_indices = @transform_5, window_bounds = array<i64: 8, 128>}]} {
    %c0_i32 = arith.constant 0 : i32
    %0 = arith.cmpi eq, %arg0, %c0_i32 : i32
    %1 = arith.extui %0 : i1 to i32
    %c0_i32_0 = arith.constant 0 : i32
    %2 = arith.cmpi ne, %1, %c0_i32_0 : i32
    scf.if %2 {
      %cst_9 = arith.constant 0.000000e+00 : f32
      %12 = vector.broadcast %cst_9 : f32 to vector<8x128xf32>
      %c0_10 = arith.constant 0 : index
      %c0_11 = arith.constant 0 : index
      %13 = vector.load %arg7[%c0_10, %c0_11] : memref<8x128xf32, #tpu.memory_space<vmem>>, vector<8x128xf32>
      tpu.vector_store %arg7[%c0_10, %c0_11], %12 {strides = array<i32>} : memref<8x128xf32, #tpu.memory_space<vmem>>, vector<8x128xf32>,
    } else {
    }
    %c0 = arith.constant 0 : index
    %c0_1 = arith.constant 0 : index
    %3 = vector.load %arg7[%c0, %c0_1] : memref<8x128xf32, #tpu.memory_space<vmem>>, vector<8x128xf32>
    %c0_2 = arith.constant 0 : index
    %c0_3 = arith.constant 0 : index
    %4 = vector.load %arg1[%c0_2, %c0_3] : memref<8x128xbf16, #tpu.memory_space<vmem>>, vector<8x128xbf16>
    %c0_4 = arith.constant 0 : index
    %c0_5 = arith.constant 0 : index
    %5 = vector.load %arg2[%c0_4, %c0_5] : memref<128x128xbf16, #tpu.memory_space<vmem>>, vector<128x128xbf16>
    %cst = arith.constant dense<0.000000e+00> : vector<8x128xf32>
    %6 = tpu.matmul %4, %5, %cst {dimension_numbers = #tpu.dot_dimension_numbers<[1], [0], [0], [1], [0, 0, 1, 1], [], []>} : vector<8x128xbf16>, vector<128x128xbf16>, vector<8x128xf32> -> vector<8x128xf32>
    %7 = arith.addf %3, %6 : vector<8x128xf32>
    %c0_6 = arith.constant 0 : index
    %c0_7 = arith.constant 0 : index
    %8 = vector.load %arg7[%c0_6, %c0_7] : memref<8x128xf32, #tpu.memory_space<vmem>>, vector<8x128xf32>
    tpu.vector_store %arg7[%c0_6, %c0_7], %7 {strides = array<i32>} : memref<8x128xf32, #tpu.memory_space<vmem>>, vector<8x128xf32>,
    %c1_i32 = arith.constant 1 : i32
    %9 = arith.cmpi eq, %arg0, %c1_i32 : i32
    %10 = arith.extui %9 : i1 to i32
    %c0_i32_8 = arith.constant 0 : i32
    %11 = arith.cmpi ne, %10, %c0_i32_8 : i32
    scf.if %11 {
      %c0_9 = arith.constant 0 : index
      %c0_10 = arith.constant 0 : index
      %12 = vector.load %arg7[%c0_9, %c0_10] : memref<8x128xf32, #tpu.memory_space<vmem>>, vector<8x128xf32>
      %c0_11 = arith.constant 0 : index
      %c0_12 = arith.constant 0 : index
      %13 = vector.load %arg3[%c0_11, %c0_12] : memref<1x128xf32, #tpu.memory_space<vmem>>, vector<1x128xf32>
      %14 = vector.broadcast %13 : vector<1x128xf32> to vector<8x128xf32>
      %15 = arith.addf %12, %14 : vector<8x128xf32>
      %16 = tpu.iota {dimensions = array<i32: 0>} : vector<8x128xi32>
      %c4_i32 = arith.constant 4 : i32
      %17 = vector.broadcast %c4_i32 : i32 to vector<8x128xi32>
      %18 = arith.cmpi slt, %16, %17 : vector<8x128xi32>
      %cst_13 = arith.constant 0.000000e+00 : f32
      %19 = vector.broadcast %cst_13 : f32 to vector<8x128xf32>
      %20 = arith.select %18, %15, %19 : vector<8x128xi1>, vector<8x128xf32>
      %cst_14 = arith.constant dense<0.000000e+00> : vector<128xf32>
      %21 = vector.multi_reduction <add>, %20, %cst_14 [0] : vector<8x128xf32> to vector<128xf32>
      %22 = vector.shape_cast %21 : vector<128xf32> to vector<1x128xf32>
      %cst_15 = arith.constant 2.500000e-01 : f32
      %23 = vector.broadcast %cst_15 : f32 to vector<1x128xf32>
      %24 = arith.mulf %22, %23 : vector<1x128xf32>
      %25 = vector.broadcast %24 : vector<1x128xf32> to vector<8x128xf32>
      %26 = arith.subf %15, %25 : vector<8x128xf32>
      %cst_16 = arith.constant 0.000000e+00 : f32
      %27 = vector.broadcast %cst_16 : f32 to vector<8x128xf32>
      %28 = arith.select %18, %26, %27 : vector<8x128xi1>, vector<8x128xf32>
      %29 = arith.mulf %28, %28 : vector<8x128xf32>
      %cst_17 = arith.constant dense<0.000000e+00> : vector<128xf32>
      %30 = vector.multi_reduction <add>, %29, %cst_17 [0] : vector<8x128xf32> to vector<128xf32>
      %31 = vector.shape_cast %30 : vector<128xf32> to vector<1x128xf32>
      %cst_18 = arith.constant 2.500000e-01 : f32
      %32 = vector.broadcast %cst_18 : f32 to vector<1x128xf32>
      %33 = arith.mulf %31, %32 : vector<1x128xf32>
      %34 = vector.broadcast %24 : vector<1x128xf32> to vector<8x128xf32>
      %35 = arith.subf %15, %34 : vector<8x128xf32>
      %cst_19 = arith.constant 9.99999974E-6 : f32
      %36 = vector.broadcast %cst_19 : f32 to vector<1x128xf32>
      %37 = arith.addf %33, %36 : vector<1x128xf32>
      %38 = math.rsqrt %37 : vector<1x128xf32>
      %39 = vector.broadcast %38 : vector<1x128xf32> to vector<8x128xf32>
      %40 = arith.mulf %35, %39 : vector<8x128xf32>
      %c0_20 = arith.constant 0 : index
      %c0_21 = arith.constant 0 : index
      %41 = vector.load %arg4[%c0_20, %c0_21] : memref<1x128xf32, #tpu.memory_space<vmem>>, vector<1x128xf32>
      %42 = vector.broadcast %41 : vector<1x128xf32> to vector<8x128xf32>
      %43 = arith.mulf %40, %42 : vector<8x128xf32>
      %c0_22 = arith.constant 0 : index
      %c0_23 = arith.constant 0 : index
      %44 = vector.load %arg5[%c0_22, %c0_23] : memref<1x128xf32, #tpu.memory_space<vmem>>, vector<1x128xf32>
      %45 = vector.broadcast %44 : vector<1x128xf32> to vector<8x128xf32>
      %46 = arith.addf %43, %45 : vector<8x128xf32>
      %cst_24 = arith.constant 0.000000e+00 : f32
      %47 = vector.broadcast %cst_24 : f32 to vector<8x128xf32>
      %48 = arith.maximumf %46, %47 : vector<8x128xf32>
      %c0_25 = arith.constant 0 : index
      %c0_26 = arith.constant 0 : index
      %49 = vector.load %arg6[%c0_25, %c0_26] : memref<8x128xf32, #tpu.memory_space<vmem>>, vector<8x128xf32>
      tpu.vector_store %arg6[%c0_25, %c0_26], %48 {strides = array<i32>} : memref<8x128xf32, #tpu.memory_space<vmem>>, vector<8x128xf32>,
    } else {
    }
    return
  }
  func.func @transform_0(%arg0: i32) -> (i32, i32) {
    %c0_i32 = arith.constant 0 : i32
    %c0_i32_0 = arith.constant 0 : i32
    return %c0_i32, %arg0 : i32, i32
  }
  func.func @transform_1(%arg0: i32) -> (i32, i32) {
    %c0_i32 = arith.constant 0 : i32
    %c0_i32_0 = arith.constant 0 : i32
    return %arg0, %c0_i32 : i32, i32
  }
  func.func @transform_2(%arg0: i32) -> (i32, i32) {
    %c0_i32 = arith.constant 0 : i32
    %c0_i32_0 = arith.constant 0 : i32
    %c0_i32_1 = arith.constant 0 : i32
    return %c0_i32, %c0_i32_0 : i32, i32
  }
  func.func @transform_3(%arg0: i32) -> (i32, i32) {
    %c0_i32 = arith.constant 0 : i32
    %c0_i32_0 = arith.constant 0 : i32
    %c0_i32_1 = arith.constant 0 : i32
    return %c0_i32, %c0_i32_0 : i32, i32
  }
  func.func @transform_4(%arg0: i32) -> (i32, i32) {
    %c0_i32 = arith.constant 0 : i32
    %c0_i32_0 = arith.constant 0 : i32
    %c0_i32_1 = arith.constant 0 : i32
    return %c0_i32, %c0_i32_0 : i32, i32
  }
  func.func @transform_5(%arg0: i32) -> (i32, i32) {
    %c0_i32 = arith.constant 0 : i32
    %c0_i32_0 = arith.constant 0 : i32
    %c0_i32_1 = arith.constant 0 : i32
    return %c0_i32, %c0_i32_0 : i32, i32
  }
}

</mosaic_0001>

<bundles_post_ra>
// kernel: tpu_custom_call.1
= control target key start
LH: loop header
LB: loop body
LE: loop exit
PB: predicated region body
PF: predicated region fallthrough
CT: control target
= control target key end

     0   :  { %10 = vsyncpa [#allocation4], 0  ;;  %s1008_s0 = inlined_call_operand.hbm [shape: bf16[8,256], index: 0, kind: input, shape index: {}]   ;;  %s1009_s1 = inlined_call_operand.hbm [shape: bf16[256,128], index: 1, kind: input, shape index: {}]   ;;  %s1010_s2 = inlined_call_operand.vmem [shape: f32[1,128], index: 2, kind: input, shape index: {}]   ;;  %s1011_s3 = inlined_call_operand.vmem [shape: f32[1,128], index: 3, kind: input, shape index: {}]   ;;  %s1012_s4 = inlined_call_operand.vmem [shape: f32[1,128], index: 4, kind: input, shape index: {}]   ;;  %s1013_s5 = inlined_call_operand.hbm [shape: f32[8,128], index: 5, kind: output, shape index: {}]  }
   0x1   :  { %12 = vsyncpa [#allocation4 + $0x1], 0 }
   0x2   :  { %13 = vsyncpa [#allocation7], 0 }
   0x3   :  { %15 = vsyncpa [#allocation7 + $0x1], 0 }
   0x4   :  { %16 = vsyncpa [#allocation5], 0  ;;  %s810_s18 = smov 0   ;;  %s812_s19 = smov 0  }
   0x5   :  { %s814_s20 = smov 0   ;;  %s816_s21 = smov 0  }
   0x6 LB: > { %s829_s22 = sadd.s32 4294967295, %s770_s21   ;;  %s832_s23 = sadd.s32 1, %s770_s21   ;;  %s770_s21 = sphi %s816_s21, %s1024_s21   ;;  %s766_s20 = sphi %s814_s20, %s1023_s20   ;;  %s762_s19 = sphi %s812_s19, %s1022_s19   ;;  %s758_s18 = sphi %s810_s18, %s1021_s18  }
   0x7   : > { %s26_s24 = ssub.s32 %s770_s21, %s832_s23  ;;  %s29_s25 = sadd.s32 1, %s766_s20 }
   0x8   : > { %p27_p0 = scmp.eq.s32.totalorder %s26_s24, 0  ;;  %p36_p1 = scmp.ne.s32.totalorder %s766_s20, %s762_s19 }
   0x9   : > { %p37_p2 = scmp.eq.s32.totalorder %s770_s21, 0  ;;  %p42_p3 = scmp.ne.s32.totalorder %s762_s19, %s758_s18 }
   0xa   : > { %s842_s26 = scalar_select %p27_p0, %s766_s20, %s29_s25  }
   0xb   : > { %p38_p4 = por %p37_p2, %p36_p1  ;;  %p43_p5 = scmp.eq.s32.totalorder %s829_s22, 0 }
   0xc   : > { %p591_p6 = scmp.lt.s32.totalorder %s770_s21, 2  ;;  %s851_s28 = sand.u32 1, %s766_s20  }
   0xd   : > { %p846_p7 = por %p43_p5, %p42_p3  ;;  %s521_s29 = sshll.u32 %s851_s28, 2 }
   0xe   : > { %s522_s30 = sshll.u32 %s770_s21, 6  ;;  %s189_s9 = scalar_lea.vmem [#allocation3], %s521_s29 }
   0xf   : > { %s1015_s27 = scalar_select %p846_p7, 1, 0 }
  0x10   : > { %s858_s8 = scalar_lea.hbm %s1008_s0, %s522_s30  ;;  %s196_s10 = sshll.u32 %s189_s9, 4  ;;  %s860_s10 = int_to_ptr.vmem [resolvable:$true] %s196_s10 }
  0x11   : > { %p862_p8 = pnand %p591_p6, %p38_p4  ;;  %s186_s12 = scalar_lea.sflag [#allocation4], %s851_s28 }
  0x12   : > { %s642_s13 = scalar_lea.hbm %s858_s8, 64  ;;  %s647_s16 = scalar_lea.hbm %s1008_s0, 128 }
  0x13   : > { %p643_p11 = scmp.ne.s32.totalorder %s858_s8, %s642_s13  ;;  %p644_p12 = pneg %p862_p8 }
  0x14   : > { %p648_p1 = scmp.lt.u32.totalorder %s858_s8, %s1008_s0  ;;  %p649_p2 = scmp.lt.u32.totalorder %s647_s16, %s642_s13 }
  0x15   : > { %p645_p13 = pnand %p644_p12, %p643_p11  ;;  %p651_p4 = scmp.lt.u32.totalorder %s642_s13, %s858_s8 }
  0x16   : > { %p650_p3 = por %p649_p2, %p648_p1 }
  0x17   : > { %p646_p0 = pneg %p645_p13 }
  0x18   : > { %p652_p5 = por %p651_p4, %p650_p3 }
  0x1a   : > { %p653_p6 = pnand %p652_p5, %p646_p0 }
  0x1c   : > { %656 = shalt.err (!%p653_p6)
}
  0x1d   : > { %s657_s24 = scalar_lea.vmem %s860_s10, 64  ;;  %s772_s25 = smov [#allocation3]  }
  0x1e   : > { %p658_p11 = scmp.ne.s32.totalorder %s860_s10, %s657_s24  ;;  %s662_s29 = sshll.u32 %s772_s25, 4  ;;  %s663_s29 = int_to_ptr.vmem [resolvable:$false] %s662_s29 }
  0x1f   : > { %s664_s30 = scalar_lea.vmem %s663_s29, 128  ;;  %p665_p10 = scmp.lt.s32.totalorder %s860_s10, %s663_s29 }
  0x20   : > { %p660_p13 = pnand %p658_p11, %p644_p12  ;;  %p666_p1 = scmp.lt.s32.totalorder %s664_s30, %s657_s24 }
  0x22   : > { %p661_p9 = pneg %p660_p13  ;;  %p667_p2 = por %p666_p1, %p665_p10 }
  0x24   : > { %p668_p3 = pnand %p667_p2, %p661_p9 }
  0x26   : > { %671 = shalt.err (!%p668_p3)
}
  0x27   : > { %587 = dma.hbm_to_vmem [thread:$0]  (!%p862_p8), %s858_s8, 64, %s860_s10, %s186_s12  }
  0x28   : > { %p1017_p0 = scmp.lt.s32.totalorder %s770_s21, 3  ;;  %p1018_p4 = scmp.ge.s32.totalorder %s770_s21, 1 }
  0x29   : > { %s523_s7 = sshll.u32 %s851_s28, 6  ;;  %s546_s9 = sshll.u32 %s770_s21, 10 }
  0x2a   : > { %p898_p5 = pnand %p1018_p4, %p1017_p0  ;;  %s907_s15 = scalar_lea.hbm %s1009_s1, %s546_s9 }
  0x2b   : > { %s207_s16 = scalar_lea.vmem [#allocation6], %s523_s7  ;;  %s204_s8 = scalar_lea.sflag [#allocation7], %s851_s28 }
  0x2c   : > { %s214_s17 = sshll.u32 %s207_s16, 4  ;;  %s672_s10 = scalar_lea.hbm %s907_s15, 1024  ;;  %s909_s17 = int_to_ptr.vmem [resolvable:$true] %s214_s17 }
  0x2d   : > { %p673_p9 = scmp.ne.s32.totalorder %s907_s15, %s672_s10  ;;  %s677_s18 = scalar_lea.hbm %s1009_s1, 2048 }
  0x2e   : > { %p678_p11 = scmp.lt.u32.totalorder %s907_s15, %s1009_s1  ;;  %p679_p13 = scmp.lt.u32.totalorder %s677_s18, %s672_s10 }
  0x2f   : > { %p675_p10 = pnand %p673_p9, %p644_p12  ;;  %p681_p2 = scmp.lt.u32.totalorder %s672_s10, %s907_s15 }
  0x30   : > { %p680_p1 = por %p679_p13, %p678_p11 }
  0x31   : > { %p676_p6 = pneg %p675_p10 }
  0x32   : > { %p682_p3 = por %p681_p2, %p680_p1 }
  0x34   : > { %p683_p0 = pnand %p682_p3, %p676_p6 }
  0x36   : > { %686 = shalt.err (!%p683_p0)
}
  0x37   : > { %s687_s29 = scalar_lea.vmem %s909_s17, 1024  ;;  %s773_s30 = smov [#allocation6]  }
  0x38   : > { %p688_p4 = scmp.ne.s32.totalorder %s909_s17, %s687_s29  ;;  %s692_s7 = sshll.u32 %s773_s30, 4  ;;  %s693_s7 = int_to_ptr.vmem [resolvable:$false] %s692_s7 }
  0x39   : > { %s694_s9 = scalar_lea.vmem %s693_s7, 2048  ;;  %p695_p7 = scmp.lt.s32.totalorder %s909_s17, %s693_s7 }
  0x3a   : > { %p690_p9 = pnand %p688_p4, %p644_p12  ;;  %p696_p11 = scmp.lt.s32.totalorder %s694_s9, %s687_s29 }
  0x3c   : > { %p691_p10 = pneg %p690_p9  ;;  %p697_p13 = por %p696_p11, %p695_p7 }
  0x3e   : > { %p698_p1 = pnand %p697_p13, %p691_p10 }
  0x40   : > { %701 = shalt.err (!%p698_p1)
}
  0x41   : > { %s774_s13 = smov 64   ;;  %s775_s14 = smov 4  }
  0x42   : > { %590 = dma.hbm_to_vmem [thread:$0]  (!%p862_p8), %s907_s15, 1024, %s909_s17, %s204_s8, %s774_s13, %s774_s13, %s775_s14  }
  0x43   : > { %226 = sbr.rel (%p898_p5) target bundleno = 425 (0x1a9), region = 40  ;;  %s228_s16 = sand.u32 (!%p898_p5), 1, %s762_s19  }
  0x44   : > { %s527_s10 = sshll.u32 (!%p898_p5), %s228_s16, 2  ;;  %s229_s21 = scalar_lea.sflag (!%p898_p5), [#allocation4], %s228_s16 }
  0x45   : > { %s940_s12 = scalar_lea.vmem (!%p898_p5), [#allocation3], %s527_s10  ;;  %p1020_p7 = scmp.ne.s32.totalorder (!%p898_p5), %s1015_s27, 0 }
  0x4a   : > { %745 = dma.done.wait (%p1020_p7), %s229_s21, 64  }
  0x4b   : > { %747 = vsyncadd (%p1020_p7), %s229_s21, 4294967232  ;;  %s528_s18 = sshll.u32 %s228_s16, 6  ;;  %s238_s11 = scalar_lea.sflag [#allocation7], %s228_s16 }
  0x4c   : > { %s946_s28 = scalar_lea.vmem [#allocation6], %s528_s18 }
  0x4d   : > { %749 = dma.done.wait (%p1020_p7), %s238_s11, 1024  }
  0x4e   : > { %751 = vsyncadd (%p1020_p7), %s238_s11, 4294966272  ;;  %p529_p8 = scmp.ne.s32.totalorder %s829_s22, 0 }
  0x4f   : > { %v776_v0 = vmov (!%p529_p8), 0.0  }
  0x50   : > { %273 = sbr.rel (%p529_p8) target bundleno = 87 (0x57), region = 52  ;;  %274 = vst [vmem:[#allocation2] sm:$0xff] (!%p529_p8), %v776_v0 }
  0x57 PF: > { %v632_v1 = vld [vmem:[%s946_s28] sm:$0xff]   ;;  %v777_v2 = vmov 0.0   ;;  %v633_v3 = vld [vmem:[%s946_s28 + $0x8] sm:$0xff]   ;;  %vm778_vm0 = vmmov 0   ;;  %v634_v4 = vld [vmem:[%s946_s28 + $0x10] sm:$0xff]   ;;  %p538_p12 = scmp.ne.s32.totalorder %s829_s22, 1 }
  0x58   : > { %556 = vmatprep.subr.bf16.mxu0 %v777_v2  ;;  %572 = vmatprep.mubr.msk.bf16.mxu0 %vm778_vm0, %v777_v2  ;;  %v635_v5 = vld [vmem:[%s946_s28 + $0x18] sm:$0xff]   ;;  %v636_v6 = vld [vmem:[%s946_s28 + $0x20] sm:$0xff]   ;;  %v637_v7 = vld [vmem:[%s946_s28 + $0x28] sm:$0xff]   ;;  %v396_v19 = vlaneseq (!%p538_p12) }
  0x59   : > { %557 = vmatpush3.bf16.msra.mxu0 %v632_v1  ;;  %v638_v8 = vld [vmem:[%s946_s28 + $0x30] sm:$0xff]   ;;  %v639_v9 = vld [vmem:[%s946_s28 + $0x38] sm:$0xff]  }
  0x5a   : > { %558 = vmatprep.subr.bf16.mxu0 %v777_v2  ;;  %v276_v10 = vld [vmem:[%s940_s12] sm:$0xf]  ;;  %v275_v11 = vld [vmem:[#allocation2] sm:$0xff]  ;;  %v397_v21 = vshrl.u32 (!%p538_p12), %v396_v19, 7 }
  0x5b   : > { %v539_v18 = vld [vmem:[%s1010_s2] ss:$0 sm:$0xff] (!%p538_p12) }
  0x5c   : > { %vm398_vm1 = vcmp.lt.s32.totalorder (!%p538_p12), %v397_v21, 4  ;;  %v540_v42 = vld [vmem:[%s1011_s3] ss:$0 sm:$0xff] (!%p538_p12) }
  0x5d   : > { %559 = vmatpush3.bf16.msra.mxu0 %v633_v3  ;;  %v541_v44 = vld [vmem:[%s1012_s4] ss:$0 sm:$0xff] (!%p538_p12) }
  0x5e   : > { %560 = vmatprep.subr.bf16.mxu0 %v777_v2 }
  0x61   : > { %561 = vmatpush3.bf16.msra.mxu0 %v634_v4 }
  0x62   : > { %562 = vmatprep.subr.bf16.mxu0 %v777_v2 }
  0x65   : > { %563 = vmatpush3.bf16.msra.mxu0 %v635_v5 }
  0x66   : > { %564 = vmatprep.subr.bf16.mxu0 %v777_v2 }
  0x69   : > { %565 = vmatpush3.bf16.msra.mxu0 %v636_v6 }
  0x6a   : > { %566 = vmatprep.subr.bf16.mxu0 %v777_v2 }
  0x6d   : > { %567 = vmatpush3.bf16.msra.mxu0 %v637_v7 }
  0x6e   : > { %568 = vmatprep.subr.bf16.mxu0 %v777_v2 }
  0x71   : > { %569 = vmatpush3.bf16.msra.mxu0 %v638_v8 }
  0x72   : > { %570 = vmatprep.subr.bf16.mxu0 %v777_v2 }
  0x75   : > { %571 = vmatpush3.bf16.msra.mxu0 %v639_v9 }
  0x78   : > { %573 = vmatmul.mubr.bf16.vlgmr.msra.gmra.mrb[0].mxu0 %v276_v10 }
 0x148   : > { %386 = sbr.rel (%p538_p12) target bundleno = 400 (0x190), region = 56 }
 0x14b   : > { %v375_v12 = vpop.f32.mrb[0].mxu0 }
 0x14c   : > { %v381_v13 = vadd.f32 %v375_v12, %v275_v11  ;;  %v574_v14 = vpop.f32.mrb[1].mxu0 }
 0x14d   : > { %v378_v15 = vpop.f32.mrb[2].mxu0 }
 0x14e   : > { %382 = vst [vmem:[#allocation2] sm:$0xff] %v381_v13  ;;  %v575_v16 = vpop.f32.mrb[3].mxu0 }
 0x155   : > { %v387_v17 = vld [vmem:[#allocation2] sm:$0xff] }
 0x156   : > { %v395_v20 = vadd.f32 %v539_v18, %v387_v17 }
 0x158   : > { %v399_v22 = vsel %vm398_vm1, %v395_v20, 0.0 }
 0x159   : > { %v400_v23 = vrot.slane %v399_v22, 4 }
 0x15b   : > { %v401_v24 = vadd.f32 %v400_v23, %v399_v22 }
 0x15d   : > { %v402_v25 = vrot.slane %v401_v24, 2 }
 0x15f   : > { %v403_v26 = vadd.f32 %v402_v25, %v401_v24 }
 0x161   : > { %v404_v27 = vrot.slane %v403_v26, 1 }
 0x163   : > { %v405_v28 = vadd.f32 %v404_v27, %v403_v26 }
 0x165   : > { %v406_v29 = vmul.f32 0.25, %v405_v28 }
 0x167   : > { %v407_v30 = vsub.f32 %v395_v20, %v406_v29 }
 0x169   : > { %v408_v31 = vsel %vm398_vm1, %v407_v30, 0.0 }
 0x16a   : > { %v409_v32 = vmul.f32 %v408_v31, %v408_v31 }
 0x16c   : > { %v410_v33 = vrot.slane %v409_v32, 4 }
 0x16e   : > { %v411_v34 = vadd.f32 %v410_v33, %v409_v32 }
 0x170   : > { %v412_v35 = vrot.slane %v411_v34, 2 }
 0x172   : > { %v413_v36 = vadd.f32 %v412_v35, %v411_v34 }
 0x174   : > { %v414_v37 = vrot.slane %v413_v36, 1 }
 0x176   : > { %v415_v38 = vadd.f32 %v414_v37, %v413_v36 }
 0x178   : > { %v416_v39 = vmul.f32 0.25, %v415_v38 }
 0x17a   : > { %v417_v40 = vadd.f32 1e-05, %v416_v39 }
 0x17c   : > { %640 = vrsqrt.f32 %v417_v40 }
 0x186   : > { %v641_v41 = vpop.eup %640 }
 0x187   : > { %v419_v43 = vmul.f32 %v641_v41, %v407_v30 }
 0x189   : > { %v427_v45 = vmul.f32 %v540_v42, %v419_v43 }
 0x18b   : > { %v435_v46 = vadd.f32 %v541_v44, %v427_v45 }
 0x18d   : > { %v436_v47 = vmax.f32 %v435_v46, 0.0 }
 0x18f   : > { %437 = vst [vmem:[#allocation8] sm:$0xff] %v436_v47 }
 0x190 PF: > { %p592_p5 = scmp.eq.s32.totalorder %s829_s22, 1  ;;  %s779_s25 = smov [#allocation8]  }
 0x191   : > { %s445_s29 = sshll.u32 %s779_s25, 4  ;;  %s446_s29 = int_to_ptr.vmem [resolvable:$true] %s445_s29 }
 0x192   : > { %s702_s30 = scalar_lea.vmem %s446_s29, 128  ;;  %p709_p0 = scmp.lt.s32.totalorder %s446_s29, %s446_s29 }
 0x193   : > { %p703_p6 = scmp.ne.s32.totalorder %s446_s29, %s702_s30  ;;  %p710_p4 = scmp.lt.s32.totalorder %s702_s30, %s702_s30 }
 0x195   : > { %p704_p2 = pnand %p703_p6, %p592_p5  ;;  %p711_p9 = por %p710_p4, %p709_p0 }
 0x197   : > { %p705_p3 = pneg %p704_p2 }
 0x199   : > { %p712_p10 = pnand %p711_p9, %p705_p3 }
 0x19b   : > { %715 = shalt.err (!%p712_p10)
}
 0x19c   : > { %s716_s13 = scalar_lea.hbm %s1013_s5, 128 }
 0x19d   : > { %p717_p11 = scmp.ne.s32.totalorder %s1013_s5, %s716_s13  ;;  %p722_p7 = scmp.lt.u32.totalorder %s716_s13, %s1013_s5 }
 0x19f   : > { %p718_p13 = pnand %p717_p11, %p592_p5 }
 0x1a1   : > { %p719_p1 = pneg %p718_p13 }
 0x1a3   : > { %p724_p8 = pnand %p722_p7, %p719_p1 }
 0x1a5   : > { %727 = shalt.err (!%p724_p8)
}
 0x1a6   : > { %581 = dma.vmem_to_hbm [thread:$0]  (%p592_p5), %s446_s29, 128, %s1013_s5, [#allocation5]  }
 0x1a7   : > { %753 = dma.done.wait (%p592_p5), [#allocation5], 128  }
 0x1a8   : > { %755 = vsyncadd (%p592_p5), [#allocation5], 4294967168 }
 0x1a9 PF: > { %p19_p12 = scmp.ge.s32.totalorder %s832_s23, 4   ;;  %s1021_s18 = smov %s762_s19 }
 0x1aa   : > { %s1022_s19 = smov %s766_s20  ;;  %s1023_s20 = smov %s842_s26 }
 0x1ab   : > { %s1024_s21 = smov %s832_s23  ;;  %21 = sbr.rel (!%p19_p12) target bundleno = 6 (0x6), region = 98 }
 0x1b2   :  { %458 = vsyncpa [#allocation4], 1 }
 0x1b3   :  { %460 = vsyncpa [#allocation4 + $0x1], 1 }
 0x1b4   :  { %461 = vsyncpa [#allocation7], 1 }
 0x1b5   :  { %463 = vsyncpa [#allocation7 + $0x1], 1 }
 0x1b6   :  { %464 = vsyncpa [#allocation5], 1 }
 0x1b7   :  { %466 = vsyncpa [#allocation5 + $0x1], 1 }

</bundles_post_ra>
